<compile_context>
chip_gen: v7x
topology: tpu7x:2x2x1
jax: 0.10.0
libtpu: 0.0.40
codegen_flags: <defaults>
</compile_context>

<pallas_src>
import functools

import jax
import jax.numpy as jnp
from jax import lax
from jax.experimental import pallas as pl
from jax.experimental.pallas import tpu as pltpu


def _round_up(x, m):
    return (x + m - 1) // m * m


def _focal_loss_kernel(logits_ref, tgt_ref, out_ref, *,
                       alpha, gamma, n_rows, tile_n, partial_sum):
    xf = logits_ref[...].astype(jnp.float32)   # (tile_n, C); no-op for f32 inputs
    t = tgt_ref[...]                           # (tile_n, 1) int32

    # --- numerically stable cross entropy (reduction='none') ---
    m = jnp.max(xf, axis=-1, keepdims=True)                              # (tile_n, 1)
    e = jnp.exp(xf - m)                                                  # (tile_n, C)
    lse = m + jnp.log(jnp.sum(e, axis=-1, keepdims=True))                # (tile_n, 1)

    col = lax.broadcasted_iota(jnp.int32, xf.shape, 1)                   # one iota / tile
    tgt_logit = jnp.sum(jnp.where(col == t, xf, 0.0), axis=-1, keepdims=True)
    ce = lse - tgt_logit                                                 # (tile_n, 1)

    # --- focal weighting ---
    pt = jnp.exp(-ce)
    one_minus_pt = 1.0 - pt
    g = float(gamma)
    if g == 2.0:
        mod = one_minus_pt * one_minus_pt
    elif g == 1.0:
        mod = one_minus_pt
    elif g == 0.0:
        mod = jnp.ones_like(one_minus_pt)
    else:
        # Clamp at 0: pt can round slightly above 1 and (negative)**gamma would
        # NaN.  (Documented divergence: PyTorch would propagate that NaN.)
        mod = jnp.maximum(one_minus_pt, 0.0) ** jnp.float32(g)
    focal = jnp.float32(alpha) * mod * ce                                # (tile_n, 1)

    # Mask rows past the real batch: tail rows of a partial last tile read
    # Pallas-padded (undefined) logits.  Required for the partial-sum path,
    # harmless (and cheap: tile_n elements) for the column path.
    row = lax.broadcasted_iota(jnp.int32, focal.shape, 0) + pl.program_id(0) * tile_n
    focal = jnp.where(row < n_rows, focal, 0.0)

    if partial_sum:
        # Per-tile partial sum: sublane reduction (tile_n,1)->(1,1), then a
        # trivial leading-dim reshape into the (1,1,1) output block.
        out_ref[...] = jnp.sum(focal, axis=0, keepdims=True).reshape(1, 1, 1)
    else:
        out_ref[...] = focal


def focal_loss(logits, targets, alpha=1.0, gamma=2.0, reduction="mean"):
    """Focal loss matching the PyTorch module ('mean' / 'sum' / 'none')."""
    n, c = logits.shape
    itemsize = int(jnp.dtype(logits.dtype).itemsize)
    packing = max(8, 32 // itemsize)              # sublane packing: f32 8, bf16 16, i8 32

    # Generation-aware scoped VMEM: ~3/4 of physical capacity
    #   v5e/v6e (128 MiB) -> 96 MiB,  v7x (64 MiB) -> 48 MiB.
    try:
        vmem_cap = int(getattr(pltpu.get_tpu_info(), "vmem_capacity_bytes", 0)) or 64 * 2**20
    except Exception:
        vmem_cap = 64 * 2**20                     # conservative (v7x-sized) fallback
    vmem_limit = min(vmem_cap * 3 // 4, 100 * 2**20)

    # VMEM accounting per row of a block:
    #   2x double-buffered logits row (input)  +  ~4 full-width f32 temporaries
    #   (x_f32, exp(x-m), int32 iota, where-select)  +  targets / slack.
    bytes_per_row = 2 * c * itemsize + 4 * c * 4 + 64
    budget = vmem_limit * 3 // 4                  # headroom for output + compiler scratch
    if packing * bytes_per_row > budget:
        # TODO(synk): add an inner "arbitrary" class-tile grid axis with an
        # online logsumexp for vocab-scale C that cannot fit as one (rows, C)
        # block (first binds on v7x's 64 MiB VMEM).
        raise NotImplementedError(
            f"C={c} too large for a single (rows, C) VMEM block on this chip")

    tile_n = budget // bytes_per_row
    tile_n = min(tile_n, (16 * 2**20) // (c * itemsize))   # <= ~16 MiB per logits buffer
    tile_n = min(tile_n, _round_up(n, packing))
    tile_n = max(packing, (tile_n // packing) * packing)
    num_tiles = pl.cdiv(n, tile_n)
    grid = (num_tiles,)

    tgt2d = targets.astype(jnp.int32).reshape(n, 1)
    reduce_in_kernel = reduction != "none"

    kernel = functools.partial(
        _focal_loss_kernel,
        alpha=float(alpha), gamma=float(gamma),
        n_rows=n, tile_n=tile_n, partial_sum=reduce_in_kernel,
    )

    in_specs = [
        # Last block dim == full array dim -> exempt from 128-lane divisibility.
        pl.BlockSpec((tile_n, c), lambda i: (i, 0)),
        pl.BlockSpec((tile_n, 1), lambda i: (i, 0)),
    ]
    # TODO(synk): if profiling at small C still shows exposed DMA, add
    # pipeline_mode=pl.Buffered(3) on the logits spec (check the v7x budget).

    if reduce_in_kernel:
        out_shape = jax.ShapeDtypeStruct((num_tiles, 1, 1), jnp.float32)
        out_specs = pl.BlockSpec((1, 1, 1), lambda i: (i, 0, 0))
        out_bytes = num_tiles * 4
    else:
        # TODO(synk): switch to a lane-dense (num_tiles, 1, tile_n) per-row
        # output (rows on lanes) once the in-kernel (tile_n,1)->(1,tile_n)
        # relayout is validated on all target generations; the column layout
        # is kept here for portability.
        out_shape = jax.ShapeDtypeStruct((n, 1), jnp.float32)
        out_specs = pl.BlockSpec((tile_n, 1), lambda i: (i, 0))
        out_bytes = n * 4

    out = pl.pallas_call(
        kernel,
        out_shape=out_shape,
        grid_spec=pl.GridSpec(grid=grid, in_specs=in_specs, out_specs=out_specs),
        compiler_params=pltpu.CompilerParams(
            # Each tile writes a disjoint output block -> megacore-safe.
            dimension_semantics=("parallel",),
            vmem_limit_bytes=int(vmem_limit),
        ),
        cost_estimate=pl.CostEstimate(
            flops=6 * n * c,
            transcendentals=n * c + 3 * n,
            bytes_accessed=n * c * itemsize + n * 4 + out_bytes,
        ),
    )(logits, tgt2d)

    if reduction == "mean":
        return jnp.sum(out) / jnp.float32(n)
    if reduction == "sum":
        return jnp.sum(out)
    return out[:, 0]


def _reference_focal_loss(logits, targets, alpha=1.0, gamma=2.0, reduction="mean"):
    logits = logits.astype(jnp.float32)
    lse = jax.scipy.special.logsumexp(logits, axis=-1)
    tgt_logit = jnp.take_along_axis(logits, targets[:, None], axis=-1)[:, 0]
    ce = lse - tgt_logit
    pt = jnp.exp(-ce)
    fl = alpha * (1.0 - pt) ** gamma * ce
    if reduction == "mean":
        return jnp.mean(fl)
    if reduction == "sum":
        return jnp.sum(fl)
    return fl


if __name__ == "__main__":
    key = jax.random.PRNGKey(0)
    k1, k2 = jax.random.split(key)

    N, C = 8, 32  # batch of 8 samples, 32 classes (C deliberately not 128-aligned)
    logits = jax.random.normal(k1, (N, C), dtype=jnp.float32)
    targets = jax.random.randint(k2, (N,), 0, C, dtype=jnp.int32)

    ok = True
    for reduction in ("mean", "sum", "none"):
        got = focal_loss(logits, targets, alpha=1.0, gamma=2.0, reduction=reduction)
        got = jax.block_until_ready(got)
        ref = _reference_focal_loss(logits, targets, alpha=1.0, gamma=2.0, reduction=reduction)
        ok = ok and bool(jnp.allclose(got, ref, rtol=1e-5, atol=1e-5))
        assert ok, (reduction, got, ref)

    print("KERNEL_OK")
</pallas_src>

<mosaic_0001>
module attributes {stable_mosaic.version = 11 : i64} {
  func.func @_focal_loss_kernel(%arg0: i32, %arg1: memref<8x32xf32, #tpu.memory_space<vmem>>, %arg2: memref<8x1xi32, #tpu.memory_space<vmem>>, %arg3: memref<1x1x1xf32, #tpu.memory_space<vmem>>) attributes {dimension_semantics = [#tpu.dimension_semantics<parallel>], iteration_bounds = array<i64: 1>, scalar_prefetch = 0 : i64, scratch_operands = 0 : i64, tpu.core_type = #tpu.core_type<tc>, window_params = [{transform_indices = @transform_0, window_bounds = array<i64: 8, 32>}, {transform_indices = @transform_1, window_bounds = array<i64: 8, 1>}, {transform_indices = @transform_2, window_bounds = array<i64: 1, 1, 1>}]} {
    %c0 = arith.constant 0 : index
    %c0_0 = arith.constant 0 : index
    %0 = vector.load %arg1[%c0, %c0_0] : memref<8x32xf32, #tpu.memory_space<vmem>>, vector<8x32xf32>
    %c0_1 = arith.constant 0 : index
    %c0_2 = arith.constant 0 : index
    %1 = vector.load %arg2[%c0_1, %c0_2] : memref<8x1xi32, #tpu.memory_space<vmem>>, vector<8x1xi32>
    %cst = arith.constant dense<0xFF800000> : vector<8xf32>
    %2 = vector.multi_reduction <maximumf>, %0, %cst [1] : vector<8x32xf32> to vector<8xf32>
    %3 = vector.shape_cast %2 : vector<8xf32> to vector<8x1xf32>
    %4 = vector.broadcast %3 : vector<8x1xf32> to vector<8x32xf32>
    %5 = arith.subf %0, %4 : vector<8x32xf32>
    %6 = math.exp %5 : vector<8x32xf32>
    %cst_3 = arith.constant dense<0.000000e+00> : vector<8xf32>
    %7 = vector.multi_reduction <add>, %6, %cst_3 [1] : vector<8x32xf32> to vector<8xf32>
    %8 = vector.shape_cast %7 : vector<8xf32> to vector<8x1xf32>
    %9 = math.log %8 : vector<8x1xf32>
    %10 = arith.addf %3, %9 : vector<8x1xf32>
    %11 = tpu.iota {dimensions = array<i32: 1>} : vector<8x32xi32>
    %12 = vector.broadcast %1 : vector<8x1xi32> to vector<8x32xi32>
    %13 = arith.cmpi eq, %11, %12 : vector<8x32xi32>
    %cst_4 = arith.constant 0.000000e+00 : f32
    %14 = vector.broadcast %cst_4 : f32 to vector<8x32xf32>
    %15 = arith.select %13, %0, %14 : vector<8x32xi1>, vector<8x32xf32>
    %cst_5 = arith.constant dense<0.000000e+00> : vector<8xf32>
    %16 = vector.multi_reduction <add>, %15, %cst_5 [1] : vector<8x32xf32> to vector<8xf32>
    %17 = vector.shape_cast %16 : vector<8xf32> to vector<8x1xf32>
    %18 = arith.subf %10, %17 : vector<8x1xf32>
    %cst_6 = arith.constant 0.000000e+00 : f32
    %19 = vector.broadcast %cst_6 : f32 to vector<8x1xf32>
    %20 = arith.subf %19, %18 : vector<8x1xf32>
    %21 = math.exp %20 : vector<8x1xf32>
    %cst_7 = arith.constant 1.000000e+00 : f32
    %22 = vector.broadcast %cst_7 : f32 to vector<8x1xf32>
    %23 = arith.subf %22, %21 : vector<8x1xf32>
    %24 = arith.mulf %23, %23 : vector<8x1xf32>
    %cst_8 = arith.constant 1.000000e+00 : f32
    %25 = vector.broadcast %cst_8 : f32 to vector<8x1xf32>
    %26 = arith.mulf %25, %24 : vector<8x1xf32>
    %27 = arith.mulf %26, %18 : vector<8x1xf32>
    %28 = tpu.iota {dimensions = array<i32: 0>} : vector<8x1xi32>
    %c8_i32 = arith.constant 8 : i32
    %29 = arith.muli %arg0, %c8_i32 : i32
    %30 = vector.broadcast %29 : i32 to vector<8x1xi32>
    %31 = arith.addi %28, %30 : vector<8x1xi32>
    %c8_i32_9 = arith.constant 8 : i32
    %32 = vector.broadcast %c8_i32_9 : i32 to vector<8x1xi32>
    %33 = arith.cmpi slt, %31, %32 : vector<8x1xi32>
    %cst_10 = arith.constant 0.000000e+00 : f32
    %34 = vector.broadcast %cst_10 : f32 to vector<8x1xf32>
    %35 = arith.select %33, %27, %34 : vector<8x1xi1>, vector<8x1xf32>
    %cst_11 = arith.constant dense<0.000000e+00> : vector<1xf32>
    %36 = vector.multi_reduction <add>, %35, %cst_11 [0] : vector<8x1xf32> to vector<1xf32>
    %37 = vector.shape_cast %36 : vector<1xf32> to vector<1x1xf32>
    %38 = vector.shape_cast %37 : vector<1x1xf32> to vector<1x1x1xf32>
    %c0_12 = arith.constant 0 : index
    %c0_13 = arith.constant 0 : index
    %c0_14 = arith.constant 0 : index
    %39 = vector.load %arg3[%c0_12, %c0_13, %c0_14] : memref<1x1x1xf32, #tpu.memory_space<vmem>>, vector<1x1x1xf32>
    tpu.vector_store %arg3[%c0_12, %c0_13, %c0_14], %38 {strides = array<i32>} : memref<1x1x1xf32, #tpu.memory_space<vmem>>, vector<1x1x1xf32>,
    return
  }
  func.func @transform_0(%arg0: i32) -> (i32, i32) {
    %c0_i32 = arith.constant 0 : i32
    %c0_i32_0 = arith.constant 0 : i32
    return %arg0, %c0_i32 : i32, i32
  }
  func.func @transform_1(%arg0: i32) -> (i32, i32) {
    %c0_i32 = arith.constant 0 : i32
    %c0_i32_0 = arith.constant 0 : i32
    return %arg0, %c0_i32 : i32, i32
  }
  func.func @transform_2(%arg0: i32) -> (i32, i32, i32) {
    %c0_i32 = arith.constant 0 : i32
    %c0_i32_0 = arith.constant 0 : i32
    %c0_i32_1 = arith.constant 0 : i32
    return %arg0, %c0_i32, %c0_i32_0 : i32, i32, i32
  }
}

</mosaic_0001>

<bundles_post_ra>
// kernel: tpu_custom_call.1
= control target key start
LH: loop header
LB: loop body
LE: loop exit
PB: predicated region body
PF: predicated region fallthrough
CT: control target
= control target key end

     0   :  { %vm14_vm0 = vcmask 261120   ;;  %s144_s0 = inlined_call_operand.vmem [shape: f32[8,32], index: 0, kind: input, shape index: {}]   ;;  %s145_s1 = inlined_call_operand.vmem [shape: s32[8,1], index: 1, kind: input, shape index: {}]   ;;  %s146_s2 = inlined_call_operand.hbm [shape: f32[1,1,1], index: 2, kind: output, shape index: {}]  }
   0x1   :  { %v12_v0 = vld [vmem:[%s144_s0] sm:$0xff] }
   0x2   :  { %7 = vsyncpa [#allocation3], 0  ;;  %v15_v1 = vsel %vm14_vm0, %v12_v0, -inf  ;;  %v106_v2 = vmov 0   ;;  %v13_v3 = vld [vmem:[%s145_s1] sm:$0xff]  ;;  %v27_v7 = vlaneseq  ;;  %s107_s0 = smov [#allocation2]  }
   0x3   :  { %75 = vset.pattern.permute.xlu0 %v106_v2  ;;  %s65_s1 = sshll.u32 %s107_s0, 4  ;;  %vm57_vm2 = vcmask 0   ;;  %s66_s1 = int_to_ptr.vmem [resolvable:$true] %s65_s1 }
   0x4   :  { %16 = vmax.xlane.f32.xlu0 %v15_v1  ;;  %v28_v8 = vand.u32 127, %v27_v7  ;;  %s82_s13 = scalar_lea.vmem %s66_s1, 16  ;;  %s86_s14 = scalar_lea.vmem %s66_s1, 32 }
   0x5   :  { %p83_p0 = scmp.ne.s32.totalorder %s66_s1, %s82_s13  ;;  %p87_p1 = scmp.lt.s32.totalorder %s66_s1, %s66_s1 }
   0x6   :  { %p88_p2 = scmp.lt.s32.totalorder %s86_s14, %s82_s13 }
   0x8   :  { %p89_p3 = por %p88_p2, %p87_p1 }
   0xa   :  { %p90_p4 = pnand %p89_p3, %p83_p0 }
  0x1a   :  { %30 = vperm.xlu0 %75, %v13_v3  }
  0x91   :  { %v17_v4 = vpop.xlane.xlu0 %16 }
  0x92   :  { %v18_v5 = vsub.f32 %v12_v0, %v17_v4 }
  0x94   :  { %v19_v6 = vmul.f32 1.442695, %v18_v5 }
  0x96   :  { %76 = vpow2.f32 %v19_v6 }
  0x99   :  { %v31_v9 = vpop.permute.xlu0 %30 }
  0x9a   :  { %vm32_vm1 = vcmp.eq.s32.totalorder %v28_v8, %v31_v9 }
  0x9b   :  { %v33_v11 = vsel %vm32_vm1, %v12_v0, 0.0 }
  0x9c   :  { %v34_v13 = vsel %vm14_vm0, %v33_v11, 0.0 }
  0xa0   :  { %v77_v10 = vpop.eup %76 }
  0xa1   :  { %v21_v12 = vsel %vm14_vm0, %v77_v10, 0.0 }
  0xa2   :  { %22 = vadd.xlane.f32.xlu1 %v21_v12 }
  0xa6   :  { %35 = vadd.xlane.f32.xlu1 %v34_v13 }
 0x12f   :  { %v23_v14 = vpop.xlane.xlu1 %22 }
 0x130   :  { %78 = vlog2.f32 %v23_v14 }
 0x133   :  { %v36_v17 = vpop.xlane.xlu1 %35 }
 0x13a   :  { %v79_v15 = vpop.eup %78 }
 0x13b   :  { %v25_v16 = vmul.f32 0.6931472, %v79_v15 }
 0x13d   :  { %v26_v18 = vadd.f32 %v25_v16, %v17_v4 }
 0x13f   :  { %v37_v19 = vsub.f32 %v26_v18, %v36_v17 }
 0x141   :  { %v38_v20 = vsub.f32 0.0, %v37_v19 }
 0x143   :  { %v39_v21 = vmul.f32 1.442695, %v38_v20 }
 0x145   :  { %80 = vpow2.f32 %v39_v21 }
 0x14f   :  { %v81_v22 = vpop.eup %80 }
 0x150   :  { %v41_v23 = vsub.f32 1.0, %v81_v22 }
 0x152   :  { %v42_v24 = vmul.f32 %v41_v23, %v41_v23 }
 0x154   :  { %v43_v25 = vmul.f32 %v42_v24, %v37_v19 }
 0x156   :  { %v51_v26 = vrot.slane %v43_v25, 4 }
 0x158   :  { %v52_v27 = vadd.f32 %v51_v26, %v43_v25 }
 0x15a   :  { %v53_v28 = vrot.slane %v52_v27, 2 }
 0x15c   :  { %v54_v29 = vadd.f32 %v53_v28, %v52_v27 }
 0x15e   :  { %v55_v30 = vrot.slane %v54_v29, 1 }
 0x160   :  { %v56_v31 = vadd.f32 %v55_v30, %v54_v29 }
 0x162   :  { %58 = vst.msk [vmem:[#allocation2] sm:$0x1] %vm57_vm2, %v56_v31 }
 0x163   :  { %93 = shalt.err (!%p90_p4)
}
 0x164   :  { %s94_s17 = scalar_lea.hbm %s146_s2, 16 }
 0x165   :  { %p95_p5 = scmp.ne.s32.totalorder %s146_s2, %s94_s17  ;;  %p98_p6 = scmp.lt.u32.totalorder %s94_s17, %s146_s2 }
 0x167   :  { %p100_p7 = pnand %p98_p6, %p95_p5 }
 0x169   :  { %103 = shalt.err (!%p100_p7)
}
 0x16a   :  { %68 = dma.vmem_to_hbm [thread:$0]  %s66_s1, 16, %s146_s2, [#allocation3]  }
 0x16b   :  { %104 = dma.done.wait [#allocation3], 16  }
 0x16c   :  { %105 = vsyncadd [#allocation3], 4294967280 }
 0x16d   :  { %72 = vsyncpa [#allocation3], 1 }

</bundles_post_ra>
